<compile_context>
chip_gen: v7x
topology: tpu7x:2x2x1
jax: 0.10.0
libtpu: 0.0.40
codegen_flags: <defaults>
</compile_context>

<pallas_src>
import functools
import math

import jax
import jax.numpy as jnp
from jax.experimental import pallas as pl
from jax.experimental.pallas import tpu as pltpu


# ----------------------------- small helpers -----------------------------

def _round_up(x, m):
    return (x + m - 1) // m * m


def _pick_tile(dim_pad, target):
    """Largest multiple of 128 that is <= target and divides dim_pad (dim_pad % 128 == 0)."""
    t = min(_round_up(target, 128), dim_pad)
    while dim_pad % t:
        t -= 128
    return t


def _pad2d(a, rows, cols):
    if a.shape == (rows, cols):
        return a
    return jnp.pad(a, ((0, rows - a.shape[0]), (0, cols - a.shape[1])))


def _vmem_limit_bytes():
    """Per-generation scoped-VMEM budget: 3/4 of physical VMEM, clamped to [32, 96] MiB.
    v5e/v6e (128 MiB) -> 96 MiB, v7x (64 MiB / TensorCore) -> 48 MiB, unknown -> 48 MiB."""
    try:
        cap = int(getattr(pltpu.get_tpu_info(), "vmem_capacity_bytes", 0)) or None
    except Exception:
        cap = None
    if cap is None:
        return 48 * 1024 * 1024
    return int(min(96 * 1024 * 1024, max(32 * 1024 * 1024, (cap * 3) // 4)))


# ----------------------------- tiled linear kernel -----------------------------

def _linear_kernel(x_ref, w_ref, b_ref, o_ref, acc_ref, *, activation):
    @pl.when(pl.program_id(2) == 0)
    def _():
        acc_ref[...] = jnp.zeros_like(acc_ref)

    acc_ref[...] += jnp.dot(x_ref[...], w_ref[...], preferred_element_type=jnp.float32)

    @pl.when(pl.program_id(2) == pl.num_programs(2) - 1)
    def _():
        y = acc_ref[...] + b_ref[...]
        if activation == "relu":
            y = jnp.maximum(y, 0.0)
        o_ref[...] = y.astype(o_ref.dtype)


def pallas_linear(x, w, b=None, activation=None, out_dtype=jnp.float32, out_rows=None,
                  vmem_limit=48 * 1024 * 1024):
    """y = act(x @ w + b): row/col/K tiled, bf16 operands on the MXU, f32 accumulation.
    `out_rows` keeps the row-padded slab so activations flow padded between layers."""
    M, K = x.shape
    N = w.shape[1]
    rows_out = M if out_rows is None else out_rows
    R = _round_up(rows_out, 128)
    K_pad, N_pad = _round_up(K, 128), _round_up(N, 128)
    big = vmem_limit >= 64 * 1024 * 1024          # v5e/v6e: larger tiles (128 MiB VMEM)
    tm = _pick_tile(R, 512 if big else 256)
    tk = _pick_tile(K_pad, 1024 if big else 512)
    tn = _pick_tile(N_pad, 1024 if big else 512)

    xp = _pad2d(x.astype(jnp.bfloat16), R, K_pad)
    wp = _pad2d(w.astype(jnp.bfloat16), K_pad, N_pad)
    if b is None:
        b = jnp.zeros((N,), jnp.float32)
    bp = _pad2d(b.reshape(1, N).astype(jnp.float32), 1, N_pad)

    out = pl.pallas_call(
        functools.partial(_linear_kernel, activation=activation),
        out_shape=jax.ShapeDtypeStruct((R, N_pad), out_dtype),
        grid_spec=pltpu.PrefetchScalarGridSpec(
            num_scalar_prefetch=0,
            grid=(R // tm, N_pad // tn, K_pad // tk),
            in_specs=[
                pl.BlockSpec((tm, tk), lambda i, j, k: (i, k)),
                pl.BlockSpec((tk, tn), lambda i, j, k: (k, j)),
                pl.BlockSpec((1, tn), lambda i, j, k: (0, j)),
            ],
            out_specs=pl.BlockSpec((tm, tn), lambda i, j, k: (i, j)),
            scratch_shapes=[pltpu.VMEM((tm, tn), jnp.float32)],
        ),
        compiler_params=pltpu.CompilerParams(
            dimension_semantics=("parallel", "parallel", "arbitrary"),
            vmem_limit_bytes=vmem_limit),
    )(xp, wp, bp)
    if N_pad > N:
        out = out[:, :N]
    if R > rows_out:
        out = out[:rows_out]
    return out


# ----------------------------- fused K/Q/V projection -----------------------------

def _kqv_kernel(x_ref, wk_ref, wq_ref, wv_ref, bk_ref, bq_ref, bv_ref,
                ko_ref, qo_ref, vo_ref, ack, acq, acv):
    @pl.when(pl.program_id(2) == 0)
    def _():
        ack[...] = jnp.zeros_like(ack)
        acq[...] = jnp.zeros_like(acq)
        acv[...] = jnp.zeros_like(acv)

    x = x_ref[...]                               # read x once, drive three MXU matmuls
    ack[...] += jnp.dot(x, wk_ref[...], preferred_element_type=jnp.float32)
    acq[...] += jnp.dot(x, wq_ref[...], preferred_element_type=jnp.float32)
    acv[...] += jnp.dot(x, wv_ref[...], preferred_element_type=jnp.float32)

    @pl.when(pl.program_id(2) == pl.num_programs(2) - 1)
    def _():
        ko_ref[...] = (ack[...] + bk_ref[...]).astype(ko_ref.dtype)
        qo_ref[...] = (acq[...] + bq_ref[...]).astype(qo_ref.dtype)
        vo_ref[...] = (acv[...] + bv_ref[...]).astype(vo_ref.dtype)


def pallas_kqv(x, wk, wq, wv, bk, bq, bv, vmem_limit):
    """Fused K/Q/V projection with three separate bf16 outputs (no [N, 3*hid] intermediate
    and no wrapper-side slicing round trip)."""
    R, K = x.shape                               # R already a multiple of 128
    hid = wk.shape[1]
    K_pad, H_pad = _round_up(K, 128), _round_up(hid, 128)
    big = vmem_limit >= 64 * 1024 * 1024
    tm = _pick_tile(R, 512 if big else 256)
    tk = _pick_tile(K_pad, 512)
    tn = _pick_tile(H_pad, 512)

    xp = _pad2d(x.astype(jnp.bfloat16), R, K_pad)
    ws = [_pad2d(w.astype(jnp.bfloat16), K_pad, H_pad) for w in (wk, wq, wv)]
    bs = [_pad2d(b.reshape(1, hid).astype(jnp.float32), 1, H_pad) for b in (bk, bq, bv)]

    k2d, q2d, v2d = pl.pallas_call(
        _kqv_kernel,
        out_shape=tuple(jax.ShapeDtypeStruct((R, H_pad), jnp.bfloat16) for _ in range(3)),
        grid_spec=pltpu.PrefetchScalarGridSpec(
            num_scalar_prefetch=0,
            grid=(R // tm, H_pad // tn, K_pad // tk),
            in_specs=[
                pl.BlockSpec((tm, tk), lambda i, j, k: (i, k)),
                pl.BlockSpec((tk, tn), lambda i, j, k: (k, j)),
                pl.BlockSpec((tk, tn), lambda i, j, k: (k, j)),
                pl.BlockSpec((tk, tn), lambda i, j, k: (k, j)),
                pl.BlockSpec((1, tn), lambda i, j, k: (0, j)),
                pl.BlockSpec((1, tn), lambda i, j, k: (0, j)),
                pl.BlockSpec((1, tn), lambda i, j, k: (0, j)),
            ],
            out_specs=tuple(pl.BlockSpec((tm, tn), lambda i, j, k: (i, j)) for _ in range(3)),
            scratch_shapes=[pltpu.VMEM((tm, tn), jnp.float32) for _ in range(3)],
        ),
        compiler_params=pltpu.CompilerParams(
            dimension_semantics=("parallel", "parallel", "arbitrary"),
            vmem_limit_bytes=vmem_limit),
    )(xp, *ws, *bs)
    if H_pad > hid:
        k2d, q2d, v2d = k2d[:, :hid], q2d[:, :hid], v2d[:, :hid]
    return k2d, q2d, v2d


# ----------------------------- head-batched relation transform -----------------------------

def _rel_kernel(x_ref, w_ref, o_ref):
    o_ref[0] = jnp.dot(x_ref[0], w_ref[0],
                       preferred_element_type=jnp.float32).astype(o_ref.dtype)


def pallas_relation(x_hm, a_rel, vmem_limit):
    """Head-batched relation transform [H, R, D] @ [H, D, D] -> [H, R, D] (bf16).
    Costs N*hid*D FLOPs - no Hx-redundant block-diagonal [hid, hid] matmul."""
    H, R, D = x_hm.shape
    tm = _pick_tile(R, 512)
    return pl.pallas_call(
        _rel_kernel,
        out_shape=jax.ShapeDtypeStruct((H, R, D), jnp.bfloat16),
        grid_spec=pltpu.PrefetchScalarGridSpec(
            num_scalar_prefetch=0,
            grid=(H, R // tm),
            in_specs=[
                pl.BlockSpec((1, tm, D), lambda h, i: (h, i, 0)),
                pl.BlockSpec((1, D, D), lambda h, i: (h, 0, 0)),
            ],
            out_specs=pl.BlockSpec((1, tm, D), lambda h, i: (h, i, 0)),
        ),
        compiler_params=pltpu.CompilerParams(
            dimension_semantics=("parallel", "parallel"),
            vmem_limit_bytes=vmem_limit),
    )(x_hm, a_rel.astype(jnp.bfloat16))


# ----------------------------- fused HGT attention kernel -----------------------------

def _gelu_erf(x):
    # Exact (erf-based) GELU matching torch.nn.functional.gelu.  erf is evaluated with the
    # Abramowitz-Stegun 7.1.26 polynomial (max abs err ~1.5e-7, below the bf16 matmul noise
    # of the surrounding ops) using only exp/mul/add/where, which all lower in Mosaic.
    z = x * 0.7071067811865476
    az = jnp.abs(z)
    t = 1.0 / (1.0 + 0.3275911 * az)
    poly = t * (0.254829592 + t * (-0.284496736 + t * (1.421413741
              + t * (-1.453152027 + t * 1.061405429))))
    erf_abs = 1.0 - poly * jnp.exp(-az * az)
    erf_z = jnp.where(z < 0.0, -erf_abs, erf_abs)
    return 0.5 * x * (1.0 + erf_z)


def _hgt_attn_kernel(counts_ref, q_ref, k_ref, v_ref, mask_ref, xd_ref, wo_ref, bo_ref,
                     gate_ref, o_ref, m_sc, l_sc, acc_sc, *, heads):
    i = pl.program_id(0)
    si = pl.program_id(1)

    @pl.when(si == 0)
    def _():
        m_sc[...] = jnp.full_like(m_sc, -1e30)
        l_sc[...] = jnp.zeros_like(l_sc)
        acc_sc[...] = jnp.zeros_like(acc_sc)

    # Block-sparse tile skip: per-(dst-tile, src-tile) edge counts were prefetched into
    # SMEM; tiles with zero edges pay no MXU / EUP / VPU work at all.
    @pl.when(counts_ref[i, si] > 0)
    def _():
        q = q_ref[...]                                    # [H, td, D] bf16, head-major
        k = k_ref[...]                                    # [H, ts, D] bf16 (rel/p_rel/scale folded)
        v = v_ref[...]                                    # [H, ts, D] bf16 (rel folded)
        # int8 -> f32 via int32 (keeps the unpack on well-trodden Mosaic lowerings).
        mult = mask_ref[...].astype(jnp.int32).astype(jnp.float32)     # [td, ts]
        has_edge = (mult > 0.0)[None, :, :]

        # All heads at once: batched einsums and full-array scratch writes -- no per-head
        # lane-misaligned slices or 1-lane masked column stores in the hot loop.
        s = jnp.einsum("htd,hsd->hts", q, k, preferred_element_type=jnp.float32)
        s = jnp.where(has_edge, s, -1e30)
        m_prev = m_sc[...]                                # [H, td, 1]
        m_new = jnp.maximum(m_prev, jnp.max(s, axis=-1, keepdims=True))
        corr = jnp.exp(m_prev - m_new)
        p = jnp.exp(s - m_new) * mult[None, :, :]         # multiplicity-aware segment softmax
        l_sc[...] = corr * l_sc[...] + jnp.sum(p, axis=-1, keepdims=True)
        acc_sc[...] = corr * acc_sc[...] + jnp.einsum(
            "hts,hsd->htd", p.astype(jnp.bfloat16), v, preferred_element_type=jnp.float32)
        m_sc[...] = m_new

    @pl.when(si == pl.num_programs(1) - 1)
    def _():
        # Normalise (EUP reciprocal; exactly 0 for isolated destination rows -> no NaNs),
        # then the fused epilogue: exact-erf GELU -> per-type out-linear -> gated skip.
        l = l_sc[...]
        inv = pl.reciprocal(jnp.maximum(l, 1e-20), approx=True)
        inv = jnp.where(l > 0.0, inv, 0.0)
        acc = acc_sc[...] * inv                           # [H, td, D]
        a = None
        for h in range(heads):                            # finalize-only: once per dst tile
            gh = _gelu_erf(acc[h])                        # [td, D]
            t = jnp.dot(gh.astype(jnp.bfloat16), wo_ref[h],
                        preferred_element_type=jnp.float32)
            a = t if a is None else a + t
        a = a + bo_ref[...]
        gate = gate_ref[0, 0]
        o_ref[...] = (gate * a
                      + (1.0 - gate) * xd_ref[...].astype(jnp.float32)).astype(o_ref.dtype)


def pallas_hgt_attention(counts, q_hm, k_hm, v_hm, mask_i8, x_dst, w_out, b_out, gate,
                         *, heads, vmem_limit):
    """Flash-style masked attention over the concatenated source blocks of one destination
    node type (block-sparse via scalar-prefetched tile edge counts), with the GELU +
    out-linear + sigmoid-gated-skip epilogue fused into the finalize step."""
    H, Nd_pad, D = q_hm.shape
    Ns_pad = k_hm.shape[1]
    hid = H * D
    n_i, n_s = counts.shape
    td, ts = Nd_pad // n_i, Ns_pad // n_s

    wo = w_out.reshape(H, D, hid).astype(jnp.bfloat16)
    bo = b_out.reshape(1, hid).astype(jnp.float32)
    gate = jnp.reshape(gate, (1, 1)).astype(jnp.float32)

    return pl.pallas_call(
        functools.partial(_hgt_attn_kernel, heads=heads),
        out_shape=jax.ShapeDtypeStruct((Nd_pad, hid), jnp.bfloat16),
        grid_spec=pltpu.PrefetchScalarGridSpec(
            num_scalar_prefetch=1,                               # tile edge counts -> SMEM
            grid=(n_i, n_s),                                     # src (reduction) axis last
            in_specs=[
                pl.BlockSpec((H, td, D), lambda i, s, c: (0, i, 0)),   # Q, head-major
                pl.BlockSpec((H, ts, D), lambda i, s, c: (0, s, 0)),   # K
                pl.BlockSpec((H, ts, D), lambda i, s, c: (0, s, 0)),   # V
                pl.BlockSpec((td, ts), lambda i, s, c: (i, s)),        # int8 multiplicity mask
                pl.BlockSpec((td, hid), lambda i, s, c: (i, 0)),       # skip input x_dst
                # TODO(synk): mark wo/bo/xd pipeline_mode=pl.Buffered(1) (grid-invariant) to
                # reclaim VMEM on v7x once single-buffering is verified on this JAX pin.
                pl.BlockSpec((H, D, hid), lambda i, s, c: (0, 0, 0)),  # out_lin weight
                pl.BlockSpec((1, hid), lambda i, s, c: (0, 0)),        # out_lin bias
                pl.BlockSpec(memory_space=pltpu.MemorySpace.SMEM),     # sigmoid(skip) gate
            ],
            out_specs=pl.BlockSpec((td, hid), lambda i, s, c: (i, 0)),
            scratch_shapes=[
                pltpu.VMEM((H, td, 1), jnp.float32),   # running max per head
                pltpu.VMEM((H, td, 1), jnp.float32),   # running denominator per head
                pltpu.VMEM((H, td, D), jnp.float32),   # output accumulator, head-major
            ],
        ),
        compiler_params=pltpu.CompilerParams(
            dimension_semantics=("parallel", "arbitrary"),
            vmem_limit_bytes=vmem_limit),
    )(counts, q_hm, k_hm, v_hm, mask_i8, x_dst, wo, bo, gate)


# ----------------------------- model glue (plain JAX) -----------------------------

def glorot(key, shape):
    fan_in, fan_out = shape[-2], shape[-1]
    limit = math.sqrt(6.0 / (fan_in + fan_out))
    return jax.random.uniform(key, shape, jnp.float32, -limit, limit)


def init_params(key, node_feat_dims, edge_types, hid, out_dim, heads, num_layers):
    keys = iter(jax.random.split(key, 256))
    D = hid // heads
    params = {
        "lin_dict": {nt: {"w": glorot(next(keys), (din, hid)),
                          "b": jnp.zeros((hid,), jnp.float32)}
                     for nt, din in node_feat_dims.items()},
        "convs": [],
        "lin": {"w": glorot(next(keys), (hid, out_dim)),
                "b": jnp.zeros((out_dim,), jnp.float32)},
    }
    for _ in range(num_layers):
        conv = {
            "kqv": {nt: {"w": glorot(next(keys), (hid, 3 * hid)),
                         "b": jnp.zeros((3 * hid,), jnp.float32)} for nt in node_feat_dims},
            "out_lin": {nt: {"w": glorot(next(keys), (hid, hid)),
                             "b": jnp.zeros((hid,), jnp.float32)} for nt in node_feat_dims},
            "k_rel": glorot(next(keys), (len(edge_types), heads, D, D)),
            "v_rel": glorot(next(keys), (len(edge_types), heads, D, D)),
            "skip": {nt: jnp.ones((), jnp.float32) for nt in node_feat_dims},  # PyG init: ones
            "p_rel": {et: jnp.ones((heads,), jnp.float32) for et in edge_types},
        }
        params["convs"].append(conv)
    return params


def _block_diag(w_heads):
    """[H, D, D] -> [H*D, H*D] block diagonal (parameter-prep only; never on activations)."""
    H, D, _ = w_heads.shape
    out = jnp.zeros((H * D, H * D), w_heads.dtype)
    for h in range(H):
        out = out.at[h * D:(h + 1) * D, h * D:(h + 1) * D].set(w_heads[h])
    return out


def _to_head_major(x2d, heads):
    """[R, hid] -> [H, R, D]: wrapper-side layout plumbing so every in-kernel access is a
    full-array, lane-dense load/store."""
    R, hid = x2d.shape
    return x2d.reshape(R, heads, hid // heads).transpose(1, 0, 2)


def hgt_conv(conv_p, x_dict, attn_meta, edge_types, heads, vmem_limit):
    hid = next(iter(x_dict.values())).shape[1]
    D = hid // heads
    scale = 1.0 / math.sqrt(D)

    # Which edge types actually feed a present destination, and per-source-type fan-out.
    active_ets = []
    for meta in attn_meta.values():
        active_ets.extend(meta["ets"])
    src_ets = {}
    for et in active_ets:
        src_ets.setdefault(et[0], []).append(et)

    # Fused K/Q/V projection per node type.  When a node type is the source of exactly one
    # active edge type, k_rel/v_rel and the p_rel/sqrt(D) scale are folded into the K/V
    # projection weights at parameter-prep time, eliminating the separate relation pass.
    k_hm, q_hm, v_hm, folded = {}, {}, {}, {}
    for nt, x in x_dict.items():
        w, b = conv_p["kqv"][nt]["w"], conv_p["kqv"][nt]["b"]
        wk, wq, wv = w[:, :hid], w[:, hid:2 * hid], w[:, 2 * hid:]   # torch.tensor_split order
        bk, bq, bv = b[:hid], b[hid:2 * hid], b[2 * hid:]
        ets_here = src_ets.get(nt, [])
        folded[nt] = len(ets_here) == 1
        if folded[nt]:
            et = ets_here[0]
            ei = edge_types.index(et)
            ak = _block_diag(conv_p["k_rel"][ei] * (conv_p["p_rel"][et] * scale)[:, None, None])
            av = _block_diag(conv_p["v_rel"][ei])
            wk, bk = wk @ ak, bk @ ak
            wv, bv = wv @ av, bv @ av
        k2d, q2d, v2d = pallas_kqv(x, wk, wq, wv, bk, bq, bv, vmem_limit)
        k_hm[nt] = _to_head_major(k2d, heads)
        q_hm[nt] = _to_head_major(q2d, heads)
        v_hm[nt] = _to_head_major(v2d, heads)

    out_dict = {}
    for dst, meta in attn_meta.items():
        k_blocks, v_blocks = [], []
        for et in meta["ets"]:
            src = et[0]
            if folded[src]:
                k_blocks.append(k_hm[src])                # relation already folded, zero cost
                v_blocks.append(v_hm[src])
            else:
                ei = edge_types.index(et)
                ak = conv_p["k_rel"][ei] * (conv_p["p_rel"][et] * scale)[:, None, None]
                k_blocks.append(pallas_relation(k_hm[src], ak, vmem_limit))
                v_blocks.append(pallas_relation(v_hm[src], conv_p["v_rel"][ei], vmem_limit))
        k_cat = k_blocks[0] if len(k_blocks) == 1 else jnp.concatenate(k_blocks, axis=1)
        v_cat = v_blocks[0] if len(v_blocks) == 1 else jnp.concatenate(v_blocks, axis=1)
        gate = jax.nn.sigmoid(conv_p["skip"][dst])
        out_dict[dst] = pallas_hgt_attention(
            meta["counts"], q_hm[dst], k_cat, v_cat, meta["mask"], x_dict[dst],
            conv_p["out_lin"][dst]["w"], conv_p["out_lin"][dst]["b"], gate,
            heads=heads, vmem_limit=vmem_limit)
    return out_dict


def hgt_forward(params, x_dict, edge_index_dict, node_types, edge_types, heads,
                output_node_types):
    # TODO(synk): optional feature_embedding_layers / L2-normalisation flags of the torch
    # module are not implemented (default None / False path only).
    vmem_limit = _vmem_limit_bytes()
    true_n = {nt: x.shape[0] for nt, x in x_dict.items()}
    row_pad = {nt: _round_up(n, 128) for nt, n in true_n.items()}

    # Per-type input projection + ReLU (lin_dict[nt](x).relu_()); activations are carried
    # row-padded + bf16 for the rest of the network (no per-layer pad/cast round trips).
    h = {nt: pallas_linear(x_dict[nt], params["lin_dict"][nt]["w"],
                           params["lin_dict"][nt]["b"], activation="relu",
                           out_dtype=jnp.bfloat16, out_rows=row_pad[nt],
                           vmem_limit=vmem_limit)
         for nt in x_dict}

    # Per-destination attention metadata depends only on the graph, so it is built ONCE
    # and reused by every layer: an int8 edge-multiplicity mask (dense, with per-src-type
    # column blocks sized to the padded row counts) plus the per-(dst-tile, src-tile)
    # edge counts driving block-sparse tile skipping.  NOTE: int8 is exact only for
    # per-(src, dst) edge multiplicities < 128.
    TD = 128                                  # dst row tile; keeps both v7x cores fed
    attn_meta = {}
    for dst in node_types:
        if dst not in x_dict:
            continue
        ets = [et for et in edge_types
               if et[2] == dst and et[0] in x_dict and et in edge_index_dict]
        if not ets:
            continue
        nd_pad = row_pad[dst]
        blocks = []
        for et in ets:
            e = edge_index_dict[et]
            blocks.append(jnp.zeros((nd_pad, row_pad[et[0]]), jnp.int32)
                          .at[e[1], e[0]].add(1))
        mask = blocks[0] if len(blocks) == 1 else jnp.concatenate(blocks, axis=1)
        ns_pad = mask.shape[1]
        ts = _pick_tile(ns_pad, 512)
        n_i, n_s = nd_pad // TD, ns_pad // ts
        counts = mask.reshape(n_i, TD, n_s, ts).sum(axis=(1, 3)).astype(jnp.int32)
        attn_meta[dst] = {"ets": ets, "mask": mask.astype(jnp.int8), "counts": counts}

    for conv_p in params["convs"]:
        h = hgt_conv(conv_p, h, attn_meta, edge_types, heads, vmem_limit)

    out = {}
    for nt in output_node_types:
        if nt in h:
            y = pallas_linear(h[nt], params["lin"]["w"], params["lin"]["b"],
                              vmem_limit=vmem_limit)
            out[nt] = y[:true_n[nt]]
        else:
            out[nt] = jnp.zeros((0,), jnp.float32)        # mirrors torch.FloatTensor([])
    return out


# ----------------------------- example run -----------------------------

if __name__ == "__main__":
    key = jax.random.PRNGKey(0)
    node_types = ["author", "paper"]
    # Two author->paper edge types exercise both the multi-source concat path and the
    # head-batched relation kernel; paper->author exercises the fold-into-kqv path.
    edge_types = [("author", "writes", "paper"),
                  ("paper", "rev_writes", "author"),
                  ("author", "cites", "paper")]
    node_feat_dims = {"author": 24, "paper": 16}
    num_nodes = {"author": 300, "paper": 260}
    num_edges = {edge_types[0]: 80, edge_types[1]: 60, edge_types[2]: 40}
    hid_dim, out_dim, num_heads, num_layers = 32, 64, 2, 2

    k_fa, k_fp, k_e0, k_e1, k_e2, k_param = jax.random.split(key, 6)
    x_dict = {
        "author": jax.random.normal(k_fa, (num_nodes["author"], node_feat_dims["author"]),
                                    jnp.float32),
        "paper": jax.random.normal(k_fp, (num_nodes["paper"], node_feat_dims["paper"]),
                                   jnp.float32),
    }

    def rand_edges(k, src_n, dst_n, ne):
        ks, kd = jax.random.split(k)
        return jnp.stack([jax.random.randint(ks, (ne,), 0, src_n),
                          jax.random.randint(kd, (ne,), 0, dst_n)]).astype(jnp.int32)

    edge_index_dict = {
        edge_types[0]: rand_edges(k_e0, num_nodes["author"], num_nodes["paper"],
                                  num_edges[edge_types[0]]),
        edge_types[1]: rand_edges(k_e1, num_nodes["paper"], num_nodes["author"],
                                  num_edges[edge_types[1]]),
        edge_types[2]: rand_edges(k_e2, num_nodes["author"], num_nodes["paper"],
                                  num_edges[edge_types[2]]),
    }

    params = init_params(k_param, node_feat_dims, edge_types, hid_dim, out_dim, num_heads,
                         num_layers)

    out = hgt_forward(params, x_dict, edge_index_dict, node_types, edge_types, num_heads,
                      output_node_types=["author", "paper"])
    out = jax.block_until_ready(out)

    for nt, emb in out.items():
        assert emb.shape == (num_nodes[nt], out_dim), (nt, emb.shape)
        assert bool(jnp.all(jnp.isfinite(emb))), nt
    print("KERNEL_OK")
</pallas_src>

<mosaic_0001>
module attributes {stable_mosaic.version = 11 : i64} {
  func.func @_linear_kernel(%arg0: i32, %arg1: i32, %arg2: i32, %arg3: memref<128x128xbf16, #tpu.memory_space<vmem>>, %arg4: memref<128x128xbf16, #tpu.memory_space<vmem>>, %arg5: memref<1x128xf32, #tpu.memory_space<vmem>>, %arg6: memref<128x128xbf16, #tpu.memory_space<vmem>>, %arg7: memref<128x128xf32, #tpu.memory_space<vmem>>) attributes {dimension_semantics = [#tpu.dimension_semantics<parallel>, #tpu.dimension_semantics<parallel>, #tpu.dimension_semantics<arbitrary>], iteration_bounds = array<i64: 3, 1, 1>, scalar_prefetch = 0 : i64, scratch_operands = 1 : i64, tpu.core_type = #tpu.core_type<tc>, window_params = [{transform_indices = @transform_0, window_bounds = array<i64: 128, 128>}, {transform_indices = @transform_1, window_bounds = array<i64: 128, 128>}, {transform_indices = @transform_2, window_bounds = array<i64: 1, 128>}, {transform_indices = @transform_3, window_bounds = array<i64: 128, 128>}]} {
    %c0_i32 = arith.constant 0 : i32
    %0 = arith.cmpi eq, %arg2, %c0_i32 : i32
    %1 = arith.extui %0 : i1 to i32
    %c0_i32_0 = arith.constant 0 : i32
    %2 = arith.cmpi ne, %1, %c0_i32_0 : i32
    scf.if %2 {
      %cst_10 = arith.constant 0.000000e+00 : f32
      %12 = vector.broadcast %cst_10 : f32 to vector<128x128xf32>
      %c0_11 = arith.constant 0 : index
      %c0_12 = arith.constant 0 : index
      %13 = vector.load %arg7[%c0_11, %c0_12] : memref<128x128xf32, #tpu.memory_space<vmem>>, vector<128x128xf32>
      tpu.vector_store %arg7[%c0_11, %c0_12], %12 {strides = array<i32>} : memref<128x128xf32, #tpu.memory_space<vmem>>, vector<128x128xf32>,
    } else {
    }
    %c0 = arith.constant 0 : index
    %c0_1 = arith.constant 0 : index
    %3 = vector.load %arg7[%c0, %c0_1] : memref<128x128xf32, #tpu.memory_space<vmem>>, vector<128x128xf32>
    %c0_2 = arith.constant 0 : index
    %c0_3 = arith.constant 0 : index
    %4 = vector.load %arg3[%c0_2, %c0_3] : memref<128x128xbf16, #tpu.memory_space<vmem>>, vector<128x128xbf16>
    %c0_4 = arith.constant 0 : index
    %c0_5 = arith.constant 0 : index
    %5 = vector.load %arg4[%c0_4, %c0_5] : memref<128x128xbf16, #tpu.memory_space<vmem>>, vector<128x128xbf16>
    %cst = arith.constant dense<0.000000e+00> : vector<128x128xf32>
    %6 = tpu.matmul %4, %5, %cst {dimension_numbers = #tpu.dot_dimension_numbers<[1], [0], [0], [1], [0, 0, 1, 1], [], []>} : vector<128x128xbf16>, vector<128x128xbf16>, vector<128x128xf32> -> vector<128x128xf32>
    %7 = arith.addf %3, %6 : vector<128x128xf32>
    %c0_6 = arith.constant 0 : index
    %c0_7 = arith.constant 0 : index
    %8 = vector.load %arg7[%c0_6, %c0_7] : memref<128x128xf32, #tpu.memory_space<vmem>>, vector<128x128xf32>
    tpu.vector_store %arg7[%c0_6, %c0_7], %7 {strides = array<i32>} : memref<128x128xf32, #tpu.memory_space<vmem>>, vector<128x128xf32>,
    %c0_i32_8 = arith.constant 0 : i32
    %9 = arith.cmpi eq, %arg2, %c0_i32_8 : i32
    %10 = arith.extui %9 : i1 to i32
    %c0_i32_9 = arith.constant 0 : i32
    %11 = arith.cmpi ne, %10, %c0_i32_9 : i32
    scf.if %11 {
      %c0_10 = arith.constant 0 : index
      %c0_11 = arith.constant 0 : index
      %12 = vector.load %arg7[%c0_10, %c0_11] : memref<128x128xf32, #tpu.memory_space<vmem>>, vector<128x128xf32>
      %c0_12 = arith.constant 0 : index
      %c0_13 = arith.constant 0 : index
      %13 = vector.load %arg5[%c0_12, %c0_13] : memref<1x128xf32, #tpu.memory_space<vmem>>, vector<1x128xf32>
      %14 = vector.broadcast %13 : vector<1x128xf32> to vector<128x128xf32>
      %15 = arith.addf %12, %14 : vector<128x128xf32>
      %cst_14 = arith.constant 0.000000e+00 : f32
      %16 = vector.broadcast %cst_14 : f32 to vector<128x128xf32>
      %17 = arith.maximumf %15, %16 : vector<128x128xf32>
      %18 = arith.truncf %17 : vector<128x128xf32> to vector<128x128xbf16>
      %c0_15 = arith.constant 0 : index
      %c0_16 = arith.constant 0 : index
      %19 = vector.load %arg6[%c0_15, %c0_16] : memref<128x128xbf16, #tpu.memory_space<vmem>>, vector<128x128xbf16>
      tpu.vector_store %arg6[%c0_15, %c0_16], %18 {strides = array<i32>} : memref<128x128xbf16, #tpu.memory_space<vmem>>, vector<128x128xbf16>,
    } else {
    }
    return
  }
  func.func @transform_0(%arg0: i32, %arg1: i32, %arg2: i32) -> (i32, i32) {
    %c0_i32 = arith.constant 0 : i32
    return %arg0, %arg2 : i32, i32
  }
  func.func @transform_1(%arg0: i32, %arg1: i32, %arg2: i32) -> (i32, i32) {
    %c0_i32 = arith.constant 0 : i32
    return %arg2, %arg1 : i32, i32
  }
  func.func @transform_2(%arg0: i32, %arg1: i32, %arg2: i32) -> (i32, i32) {
    %c0_i32 = arith.constant 0 : i32
    %c0_i32_0 = arith.constant 0 : i32
    return %c0_i32, %arg1 : i32, i32
  }
  func.func @transform_3(%arg0: i32, %arg1: i32, %arg2: i32) -> (i32, i32) {
    %c0_i32 = arith.constant 0 : i32
    return %arg0, %arg1 : i32, i32
  }
}

</mosaic_0001>

<bundles_post_ra>
// kernel: tpu_custom_call.1
= control target key start
LH: loop header
LB: loop body
LE: loop exit
PB: predicated region body
PF: predicated region fallthrough
CT: control target
= control target key end

     0   :  { %8 = vsyncpa [#allocation4], 0  ;;  %s1514_s0 = inlined_call_operand.hbm [shape: bf16[384,128], index: 0, kind: input, shape index: {}]   ;;  %s1515_s1 = inlined_call_operand.hbm [shape: bf16[128,128], index: 1, kind: input, shape index: {}]   ;;  %s1516_s2 = inlined_call_operand.vmem [shape: f32[1,128], index: 2, kind: input, shape index: {}]   ;;  %s1517_s3 = inlined_call_operand.hbm [shape: bf16[384,128], index: 3, kind: output, shape index: {}]  }
   0x1   :  { %10 = vsyncpa [#allocation4 + $0x1], 0 }
   0x2   :  { %11 = vsyncpa [#allocation7], 0 }
   0x3   :  { %12 = vsyncpa [#allocation5], 0 }
   0x4   :  { %14 = vsyncpa [#allocation5 + $0x1], 0  ;;  %s1263_s12 = smov 0   ;;  %s1265_s13 = smov 0  }
   0x5   :  { %s1267_s14 = smov 0   ;;  %s1269_s15 = smov 0  }
   0x6   :  { %s1271_s16 = smov 0   ;;  %s1273_s17 = smov 0  }
   0x7 LB: > { %s817_s18 = sadd.s32 4294967295, %s1234_s17   ;;  %s818_s19 = sadd.s32 4294967294, %s1234_s17   ;;  %s1234_s17 = sphi %s1273_s17, %s20_s17   ;;  %s1230_s16 = sphi %s1271_s16, %s1540_s16   ;;  %s1226_s15 = sphi %s1269_s15, %s1539_s15   ;;  %s1222_s14 = sphi %s1267_s14, %s1538_s14   ;;  %s1218_s13 = sphi %s1265_s13, %s1537_s13   ;;  %s1214_s12 = sphi %s1263_s12, %s1536_s12  }
   0x8   : > { %p61_p0 = scmp.ne.s32.totalorder %s1218_s13, %s1214_s12  ;;  %p1297_p1 = scmp.eq.s32.totalorder %s817_s18, 0 }
   0x9   : > { %p1301_p2 = scmp.eq.s32.totalorder %s817_s18, 2  ;;  %p147_p3 = scmp.eq.s32.totalorder %s818_s19, 2 }
   0xa   : > { %s1522_s20 = scalar_select %p1297_p1, 1, 0 }
   0xb   : > { %s1523_s21 = scalar_select %p1301_p2, 1, 0 }
   0xc   : > { %p1307_p4 = por %p1297_p1, %p61_p0  ;;  %p819_p5 = scmp.ge.s32.totalorder %s1234_s17, 1 }
   0xd   : > { %p1312_p6 = por %p147_p3, %p61_p0  ;;  %p154_p7 = scmp.lt.s32.totalorder %s1234_s17, 4 }
   0xe   : > { %s1524_s22 = scalar_select %p1307_p4, 1, 0 }
   0xf   : > { %s1525_s23 = scalar_select %p1312_p6, 1, 0 }
  0x10   : > { %p1317_p8 = pnand %p819_p5, %p154_p7  ;;  %s1236_s25 = smov [#allocation6]  }
  0x11   : > { %s170_s26 = sshll.u32 %s1236_s25, 4  ;;  %s39_s28 = sadd.s32 1, %s1230_s16  ;;  %s171_s26 = int_to_ptr.vmem [resolvable:$true] %s170_s26 }
  0x12   : > { %s1526_s24 = scalar_select %p1317_p8, 1, 0 }
  0x13   : > { %p1005_p9 = pneg %p1317_p8  ;;  %s1090_s4 = scalar_lea.hbm %s1515_s1, 1024 }
  0x14   : > { %p1091_p11 = scmp.ne.s32.totalorder %s1515_s1, %s1090_s4  ;;  %p1097_p3 = scmp.lt.u32.totalorder %s1090_s4, %s1515_s1 }
  0x15   : > { %p1325_p10 = pnand %p1005_p9, %p1297_p1 }
  0x17   : > { %p1092_p12 = pneg %p1325_p10 }
  0x19   : > { %p1093_p13 = pnand %p1092_p12, %p1091_p11 }
  0x1b   : > { %p1094_p0 = pneg %p1093_p13 }
  0x1d   : > { %p1099_p5 = pnand %p1097_p3, %p1094_p0 }
  0x1f   : > { %1102 = shalt.err (!%p1099_p5)
}
  0x20   : > { %s1103_s9 = scalar_lea.vmem %s171_s26, 1024  ;;  %p1111_p1 = scmp.lt.s32.totalorder %s171_s26, %s171_s26 }
  0x21   : > { %p1104_p7 = scmp.ne.s32.totalorder %s171_s26, %s1103_s9  ;;  %p1112_p4 = scmp.lt.s32.totalorder %s1103_s9, %s1103_s9 }
  0x23   : > { %p1106_p9 = pnand %p1104_p7, %p1092_p12  ;;  %p1113_p8 = por %p1112_p4, %p1111_p1 }
  0x25   : > { %p1107_p6 = pneg %p1106_p9 }
  0x27   : > { %p1114_p2 = pnand %p1113_p8, %p1107_p6 }
  0x29   : > { %1117 = shalt.err (!%p1114_p2)
}
  0x2a   : > { %s1237_s10 = smov 64   ;;  %s1238_s11 = smov 4  }
  0x2b   : > { %1008 = dma.hbm_to_vmem [thread:$0]  (!%p1325_p10), %s1515_s1, 1024, %s171_s26, [#allocation7], %s1237_s10, %s1237_s10, %s1238_s11  }
  0x2c   : > { %p41_p1 = scmp.ge.s32.totalorder %s39_s28, 3  ;;  %s48_s25 = sadd.s32 1, %s1222_s14 }
  0x2d   : > { %p55_p2 = scmp.ne.s32.totalorder %s1222_s14, %s1218_s13  ;;  %p56_p4 = scmp.eq.s32.totalorder %s1234_s17, 0 }
  0x2e   : > { %s1542_s28 = smov (%p41_p1, %s39_s28), 0  ;;  %p1529_p8 = scmp.ne.s32.totalorder %s1523_s21, 0 }
  0x2f   : > { %p1355_p6 = por %p56_p4, %p55_p2  ;;  %s43_s30 = ssub.s32 %s1230_s16, %s1542_s28 }
  0x30   : > { %p1361_p11 = por %p1529_p8, %p55_p2  ;;  %p1018_p12 = scmp.lt.s32.totalorder %s1234_s17, 3 }
  0x31   : > { %p46_p10 = scmp.eq.s32.totalorder %s43_s30, 0  ;;  %s190_s26 = sand.u32 1, %s1222_s14  }
  0x32   : > { %s823_s4 = sshll.u32 %s190_s26, 6  ;;  %s868_s6 = sshll.u32 %s1230_s16, 10 }
  0x33   : > { %s1370_s5 = scalar_select %p46_p10, %s1222_s14, %s48_s25  }
  0x34   : > { %s1376_s9 = scalar_lea.hbm %s1514_s0, %s868_s6  ;;  %s194_s21 = scalar_lea.vmem [#allocation3], %s823_s4 }
  0x35   : > { %s202_s18 = sshll.u32 %s194_s21, 4  ;;  %p1382_p13 = pnand %p1018_p12, %p1355_p6  ;;  %s1378_s18 = int_to_ptr.vmem [resolvable:$true] %s202_s18 }
  0x36   : > { %s1386_s25 = scalar_lea.sflag [#allocation4], %s190_s26  ;;  %s1118_s30 = scalar_lea.hbm %s1376_s9, 1024 }
  0x37   : > { %p1119_p0 = scmp.ne.s32.totalorder %s1376_s9, %s1118_s30  ;;  %p1120_p3 = pneg %p1382_p13 }
  0x38   : > { %s1123_s29 = scalar_lea.hbm %s1514_s0, 3072  ;;  %p1124_p9 = scmp.lt.u32.totalorder %s1376_s9, %s1514_s0 }
  0x39   : > { %p1121_p5 = pnand %p1120_p3, %p1119_p0  ;;  %p1125_p1 = scmp.lt.u32.totalorder %s1123_s29, %s1118_s30 }
  0x3a   : > { %p1127_p4 = scmp.lt.u32.totalorder %s1118_s30, %s1376_s9 }
  0x3b   : > { %p1122_p7 = pneg %p1121_p5  ;;  %p1126_p2 = por %p1125_p1, %p1124_p9 }
  0x3d   : > { %p1128_p6 = por %p1127_p4, %p1126_p2 }
  0x3f   : > { %p1129_p8 = pnand %p1128_p6, %p1122_p7 }
  0x41   : > { %1132 = shalt.err (!%p1129_p8)
}
  0x42   : > { %s1133_s26 = scalar_lea.vmem %s1378_s18, 1024  ;;  %s1239_s21 = smov [#allocation3]  }
  0x43   : > { %p1134_p12 = scmp.ne.s32.totalorder %s1378_s18, %s1133_s26  ;;  %s1138_s4 = sshll.u32 %s1239_s21, 4  ;;  %s1139_s4 = int_to_ptr.vmem [resolvable:$false] %s1138_s4 }
  0x44   : > { %s1140_s6 = scalar_lea.vmem %s1139_s4, 2048  ;;  %p1141_p5 = scmp.lt.s32.totalorder %s1378_s18, %s1139_s4 }
  0x45   : > { %p1136_p10 = pnand %p1134_p12, %p1120_p3  ;;  %p1142_p9 = scmp.lt.s32.totalorder %s1140_s6, %s1133_s26 }
  0x47   : > { %p1137_p0 = pneg %p1136_p10  ;;  %p1143_p1 = por %p1142_p9, %p1141_p5 }
  0x49   : > { %p1144_p2 = pnand %p1143_p1, %p1137_p0 }
  0x4b   : > { %1147 = shalt.err (!%p1144_p2)
}
  0x4c   : > { %1012 = dma.hbm_to_vmem [thread:$0]  (!%p1382_p13), %s1376_s9, 1024, %s1378_s18, %s1386_s25, %s1237_s10, %s1237_s10, %s1238_s11  }
  0x4d   : > { %p1532_p3 = scmp.ne.s32.totalorder %s1526_s24, 0 }
  0x4e   : > { %s1420_s30 = sand.u32 (!%p1532_p3), 1, %s1218_s13   ;;  %p1533_p7 = scmp.ne.s32.totalorder (!%p1532_p3), %s1524_s22, 0 }
  0x4f   : > { %214 = sbr.rel (%p1532_p3) target bundleno = 367 (0x16f), region = 32  ;;  %s827_s29 = sshll.u32 (!%p1532_p3), %s1420_s30, 6 }
  0x50   : > { %s217_s7 = scalar_lea.sflag (!%p1532_p3), [#allocation4], %s1420_s30  ;;  %s1426_s19 = scalar_lea.vmem (!%p1532_p3), [#allocation3], %s827_s29 }
  0x56   : > { %1201 = dma.done.wait (%p1533_p7), %s217_s7, 1024  }
  0x57   : > { %1203 = vsyncadd (%p1533_p7), %s217_s7, 4294966272  ;;  %p1534_p13 = scmp.ne.s32.totalorder %s1522_s20, 0 }
  0x59   : > { %1205 = dma.done.wait (%p1534_p13), [#allocation7], 1024  }
  0x5a   : > { %1207 = vsyncadd (%p1534_p13), [#allocation7], 4294966272  ;;  %v1074_v0 = vld [vmem:[#allocation6] sm:$0xff]   ;;  %v1075_v1 = vld [vmem:[#allocation6 + $0x8] sm:$0xff]   ;;  %s1449_s24 = scalar_lea.vmem [#allocation8], %s827_s29  ;;  %s885_s11 = sshll.u32 %s1226_s15, 10 }
  0x5b   : > { %949 = vmatprep.subr.bf16.mxu0 %v1074_v0  ;;  %981 = vmatprep.subr.bf16.mxu1 %v1074_v0  ;;  %v1076_v2 = vld [vmem:[#allocation6 + $0x10] sm:$0xff]   ;;  %v1077_v3 = vld [vmem:[#allocation6 + $0x18] sm:$0xff]   ;;  %v1082_v4 = vld [vmem:[%s1426_s19] sm:$0xff]   ;;  %s703_s10 = sshll.u32 %s1449_s24, 4  ;;  %s1462_s18 = scalar_lea.hbm %s1517_s3, %s885_s11  ;;  %s1457_s10 = int_to_ptr.vmem [resolvable:$true] %s703_s10 }
  0x5c   : > { %950 = vmatpush3.bf16.msra.mxu0 %v1074_v0  ;;  %989 = vmatpush3.bf16.msra.mxu1 %v1074_v0  ;;  %v1083_v5 = vld [vmem:[%s1426_s19 + $0x20] sm:$0xff]   ;;  %v1079_v7 = vld [vmem:[#allocation6 + $0x28] sm:$0xff]   ;;  %v1080_v8 = vld [vmem:[#allocation6 + $0x30] sm:$0xff]   ;;  %s689_s25 = scalar_lea.sflag [#allocation5], %s1420_s30  ;;  %s1148_s8 = scalar_lea.vmem %s1457_s10, 1024 }
  0x5d   : > { %951 = vmatprep.subr.bf16.mxu0 %v1075_v1  ;;  %982 = vmatprep.subr.bf16.mxu1 %v1075_v1  ;;  %v1078_v6 = vld [vmem:[#allocation6 + $0x20] sm:$0xff]   ;;  %v1081_v9 = vld [vmem:[#allocation6 + $0x38] sm:$0xff]   ;;  %v1084_v10 = vld [vmem:[%s1426_s19 + $0x8] sm:$0xff]   ;;  %p1149_p4 = scmp.ne.s32.totalorder %s1457_s10, %s1148_s8  ;;  %s1240_s26 = smov [#allocation8]  }
  0x5e   : > { %965 = vmatprep.mubr.bf16.mxu0 %v1082_v4  ;;  %973 = vmatprep.mubr.bf16.mxu1 %v1083_v5  ;;  %v1085_v11 = vld [vmem:[%s1426_s19 + $0x28] sm:$0xff]   ;;  %v1086_v12 = vld [vmem:[%s1426_s19 + $0x10] sm:$0xff]   ;;  %v1088_v14 = vld [vmem:[%s1426_s19 + $0x18] sm:$0xff]   ;;  %s1152_s21 = sshll.u32 %s1240_s26, 4  ;;  %s1153_s21 = int_to_ptr.vmem [resolvable:$false] %s1152_s21 }
  0x5f   : > { %v1087_v13 = vld [vmem:[%s1426_s19 + $0x30] sm:$0xff]   ;;  %v1089_v15 = vld [vmem:[%s1426_s19 + $0x38] sm:$0xff]   ;;  %v846_v16 = vld [vmem:[%s1516_s2] ss:$0 sm:$0xff]  ;;  %p1150_p6 = pnand %p1149_p4, %p1361_p11  ;;  %s1154_s4 = scalar_lea.vmem %s1153_s21, 2048 }
  0x60   : > { %952 = vmatpush3.bf16.msra.mxu0 %v1075_v1  ;;  %990 = vmatpush3.bf16.msra.mxu1 %v1075_v1  ;;  %p1155_p12 = scmp.lt.s32.totalorder %s1457_s10, %s1153_s21  ;;  %p1156_p10 = scmp.lt.s32.totalorder %s1154_s4, %s1148_s8 }
  0x61   : > { %953 = vmatprep.subr.bf16.mxu0 %v1076_v2  ;;  %983 = vmatprep.subr.bf16.mxu1 %v1076_v2  ;;  %p1151_p8 = pneg %p1150_p6 }
  0x62   : > { %p1157_p0 = por %p1156_p10, %p1155_p12 }
  0x64   : > { %954 = vmatpush3.bf16.msra.mxu0 %v1076_v2  ;;  %991 = vmatpush3.bf16.msra.mxu1 %v1076_v2  ;;  %p1158_p5 = pnand %p1157_p0, %p1151_p8 }
  0x65   : > { %955 = vmatprep.subr.bf16.mxu0 %v1077_v3  ;;  %984 = vmatprep.subr.bf16.mxu1 %v1077_v3 }
  0x68   : > { %956 = vmatpush3.bf16.msra.mxu0 %v1077_v3  ;;  %992 = vmatpush3.bf16.msra.mxu1 %v1077_v3 }
  0x69   : > { %957 = vmatprep.subr.bf16.mxu0 %v1078_v6  ;;  %985 = vmatprep.subr.bf16.mxu1 %v1078_v6 }
  0x6c   : > { %958 = vmatpush3.bf16.msra.mxu0 %v1078_v6  ;;  %993 = vmatpush3.bf16.msra.mxu1 %v1078_v6 }
  0x6d   : > { %959 = vmatprep.subr.bf16.mxu0 %v1079_v7  ;;  %986 = vmatprep.subr.bf16.mxu1 %v1079_v7 }
  0x70   : > { %960 = vmatpush3.bf16.msra.mxu0 %v1079_v7  ;;  %994 = vmatpush3.bf16.msra.mxu1 %v1079_v7 }
  0x71   : > { %961 = vmatprep.subr.bf16.mxu0 %v1080_v8  ;;  %987 = vmatprep.subr.bf16.mxu1 %v1080_v8 }
  0x74   : > { %962 = vmatpush3.bf16.msra.mxu0 %v1080_v8  ;;  %995 = vmatpush3.bf16.msra.mxu1 %v1080_v8 }
  0x75   : > { %963 = vmatprep.subr.bf16.mxu0 %v1081_v9  ;;  %988 = vmatprep.subr.bf16.mxu1 %v1081_v9 }
  0x78   : > { %964 = vmatpush3.bf16.msra.mxu0 %v1081_v9  ;;  %996 = vmatpush3.bf16.msra.mxu1 %v1081_v9 }
  0x7b   : > { %966 = vmatmul.mubr.bf16.vlgmr.msra.gmra.mrb[0].mxu0 %v1084_v10  ;;  %974 = vmatmul.mubr.bf16.vlgmr.msra.gmra.mrb[0].mxu1 %v1085_v11 }
  0x7c   : > { %969 = vmatprep.mubr.bf16.mxu0 %v1086_v12  ;;  %977 = vmatprep.mubr.bf16.mxu1 %v1087_v13 }
  0x83   : > { %970 = vmatmul.mubr.bf16.gmra.mrb[4].mxu0 %v1088_v14  ;;  %978 = vmatmul.mubr.bf16.gmra.mrb[4].mxu1 %v1089_v15 }
 0x14e   : > { %v967_v17 = vpop.f32.mrb[0].mxu0  ;;  %v975_v18 = vpop.f32.mrb[0].mxu1 }
 0x14f   : > { %v578_v19 = vadd.f32 %v967_v17, %v846_v16  ;;  %v586_v20 = vadd.f32 %v975_v18, %v846_v16  ;;  %v455_v21 = vpop.f32.mrb[1].mxu0  ;;  %v487_v22 = vpop.f32.mrb[1].mxu1 }
 0x150   : > { %v576_v23 = vadd.f32 %v846_v16, %v455_v21  ;;  %v584_v24 = vadd.f32 %v846_v16, %v487_v22  ;;  %v968_v25 = vpop.f32.mrb[2].mxu0  ;;  %v976_v26 = vpop.f32.mrb[2].mxu1 }
 0x151   : > { %v579_v27 = vadd.f32 %v968_v25, %v846_v16  ;;  %v587_v28 = vadd.f32 %v976_v26, %v846_v16  ;;  %v458_v29 = vpop.f32.mrb[3].mxu0  ;;  %v490_v30 = vpop.f32.mrb[3].mxu1  ;;  %v594_v33 = vmax.f32 %v578_v19, 0.0  ;;  %v602_v34 = vmax.f32 %v586_v20, 0.0 }
 0x152   : > { %v577_v31 = vadd.f32 %v846_v16, %v458_v29  ;;  %v585_v32 = vadd.f32 %v846_v16, %v490_v30  ;;  %v592_v37 = vmax.f32 %v576_v23, 0.0  ;;  %v600_v38 = vmax.f32 %v584_v24, 0.0 }
 0x153   : > { %v595_v35 = vmax.f32 %v579_v27, 0.0  ;;  %v603_v36 = vmax.f32 %v587_v28, 0.0 }
 0x154   : > { %v593_v39 = vmax.f32 %v577_v31, 0.0  ;;  %v601_v40 = vmax.f32 %v585_v32, 0.0 }
 0x155   : > { %v894_v41 = vpack.c.bf16 %v595_v35, %v594_v33  ;;  %v914_v42 = vpack.c.bf16 %v603_v36, %v602_v34 }
 0x156   : > { %v889_v43 = vpack.c.bf16 %v593_v39, %v592_v37  ;;  %v909_v44 = vpack.c.bf16 %v601_v40, %v600_v38  ;;  %v971_v45 = vpop.f32.mrb[4].mxu0  ;;  %v979_v46 = vpop.f32.mrb[4].mxu1 }
 0x157   : > { %926 = vst [vmem:[%s1449_s24 + $0x8] sm:$0xff] %v894_v41   ;;  %930 = vst [vmem:[%s1449_s24 + $0x28] sm:$0xff] %v914_v42   ;;  %v582_v47 = vadd.f32 %v971_v45, %v846_v16  ;;  %v590_v48 = vadd.f32 %v979_v46, %v846_v16  ;;  %v471_v49 = vpop.f32.mrb[5].mxu0  ;;  %v503_v50 = vpop.f32.mrb[5].mxu1 }
 0x158   : > { %890 = vst [vmem:[%s1449_s24] sm:$0xff] %v889_v43   ;;  %929 = vst [vmem:[%s1449_s24 + $0x20] sm:$0xff] %v909_v44   ;;  %v580_v51 = vadd.f32 %v846_v16, %v471_v49  ;;  %v588_v52 = vadd.f32 %v846_v16, %v503_v50  ;;  %v972_v53 = vpop.f32.mrb[6].mxu0  ;;  %v980_v54 = vpop.f32.mrb[6].mxu1 }
 0x159   : > { %v583_v55 = vadd.f32 %v972_v53, %v846_v16  ;;  %v591_v56 = vadd.f32 %v980_v54, %v846_v16  ;;  %v474_v57 = vpop.f32.mrb[7].mxu0  ;;  %v506_v58 = vpop.f32.mrb[7].mxu1  ;;  %v598_v61 = vmax.f32 %v582_v47, 0.0  ;;  %v606_v62 = vmax.f32 %v590_v48, 0.0 }
 0x15a   : > { %v581_v59 = vadd.f32 %v846_v16, %v474_v57  ;;  %v589_v60 = vadd.f32 %v846_v16, %v506_v58  ;;  %v596_v1 = vmax.f32 %v580_v51, 0.0  ;;  %v604_v2 = vmax.f32 %v588_v52, 0.0 }
 0x15b   : > { %v599_v63 = vmax.f32 %v583_v55, 0.0  ;;  %v607_v0 = vmax.f32 %v591_v56, 0.0 }
 0x15c   : > { %v597_v3 = vmax.f32 %v581_v59, 0.0  ;;  %v605_v4 = vmax.f32 %v589_v60, 0.0 }
 0x15d   : > { %v904_v5 = vpack.c.bf16 %v599_v63, %v598_v61  ;;  %v924_v6 = vpack.c.bf16 %v607_v0, %v606_v62 }
 0x15e   : > { %v899_v7 = vpack.c.bf16 %v597_v3, %v596_v1  ;;  %v919_v8 = vpack.c.bf16 %v605_v4, %v604_v2 }
 0x15f   : > { %928 = vst [vmem:[%s1449_s24 + $0x18] sm:$0xff] %v904_v5   ;;  %932 = vst [vmem:[%s1449_s24 + $0x38] sm:$0xff] %v924_v6  }
 0x160   : > { %927 = vst [vmem:[%s1449_s24 + $0x10] sm:$0xff] %v899_v7   ;;  %931 = vst [vmem:[%s1449_s24 + $0x30] sm:$0xff] %v919_v8  }
 0x161   : > { %1161 = shalt.err (!%p1158_p5)
}
 0x162   : > { %s1162_s6 = scalar_lea.hbm %s1462_s18, 1024  ;;  %s1166_s19 = scalar_lea.hbm %s1517_s3, 3072 }
 0x163   : > { %p1163_p9 = scmp.ne.s32.totalorder %s1462_s18, %s1162_s6  ;;  %p1167_p3 = scmp.lt.u32.totalorder %s1462_s18, %s1517_s3 }
 0x164   : > { %p1168_p7 = scmp.lt.u32.totalorder %s1166_s19, %s1162_s6  ;;  %p1170_p4 = scmp.lt.u32.totalorder %s1162_s6, %s1462_s18 }
 0x165   : > { %p1164_p1 = pnand %p1163_p9, %p1361_p11 }
 0x166   : > { %p1169_p13 = por %p1168_p7, %p1167_p3 }
 0x167   : > { %p1165_p2 = pneg %p1164_p1 }
 0x168   : > { %p1171_p6 = por %p1170_p4, %p1169_p13 }
 0x16a   : > { %p1172_p8 = pnand %p1171_p6, %p1165_p2 }
 0x16c   : > { %1175 = shalt.err (!%p1172_p8)
}
 0x16d   : > { %s1241_s24 = smov 64   ;;  %s1242_s11 = smov 4  }
 0x16e   : > { %1003 = dma.vmem_to_hbm [thread:$0]  (%p1361_p11), %s1457_s10, 1024, %s1462_s18, %s689_s25, %s1241_s24, %s1241_s24, %s1242_s11  }
 0x16f PF: > { %p1020_p12 = scmp.ge.s32.totalorder %s1234_s17, 2  ;;  %s718_s15 = sand.u32 1, %s1214_s12  }
 0x170   : > { %p1535_p10 = scmp.ne.s32.totalorder %s1525_s23, 0  ;;  %s719_s9 = scalar_lea.sflag [#allocation5], %s718_s15 }
 0x172   : > { %p1014_p0 = pnand %p1020_p12, %p1535_p10 }
 0x174   : > { %1209 = dma.done.wait (!%p1014_p0), %s719_s9, 1024  }
 0x175   : > { %1211 = vsyncadd (!%p1014_p0), %s719_s9, 4294966272  ;;  %s20_s17 = sadd.s32 1, %s1234_s17   ;;  %s1536_s12 = smov %s1218_s13 }
 0x176   : > { %p17_p5 = scmp.ge.s32.totalorder %s20_s17, 5   ;;  %s1537_s13 = smov %s1222_s14 }
 0x177   : > { %s1538_s14 = smov %s1370_s5  ;;  %s1539_s15 = smov %s1230_s16 }
 0x178   : > { %s1540_s16 = smov %s1542_s28  ;;  %19 = sbr.rel (!%p17_p5) target bundleno = 7 (0x7), region = 93 }
 0x17f   :  { %724 = vsyncpa [#allocation4], 1 }
 0x180   :  { %726 = vsyncpa [#allocation4 + $0x1], 1 }
 0x181   :  { %727 = vsyncpa [#allocation7], 1 }
 0x182   :  { %728 = vsyncpa [#allocation5], 1 }
 0x183   :  { %730 = vsyncpa [#allocation5 + $0x1], 1 }

</bundles_post_ra>
